<compile_context>
chip_gen: v7x
topology: tpu7x:2x2x1
jax: 0.10.0
libtpu: 0.0.40
codegen_flags: <defaults>
</compile_context>

<pallas_src>
import functools

import jax
import jax.numpy as jnp
from jax.experimental import pallas as pl
from jax.experimental.pallas import tpu as pltpu


# Packed-parameter layout (25 f32 scalars, live in SMEM):
#   params[3*k + j] = w1[k, j]   k in [0,6), j in [0,3)   (w1 stored (in,out))
#   params[18 + j]  = b1[j]
#   params[21 + j]  = w2[j, 0]
#   params[24]      = b2[0]
_N_PARAMS = 25
_LANES = 128


def mlp_kernel(params_ref, x_ref, probs_ref, preds_ref):
    # params_ref: SMEM (25,)            f32
    # x_ref:      VMEM (6, S, 128)      f32   -- batch on (sublanes, lanes)
    # probs_ref:  VMEM (S, 128)         bf16
    # preds_ref:  VMEM (S, 128)         int8
    rows = [x_ref[k] for k in range(6)]              # each (S, 128)

    # Layer 1: three hidden units as scalar-broadcast multiply-adds (pure VPU),
    # sigmoids go to the EUP slot.
    h = []
    for j in range(3):
        z = params_ref[j] * rows[0]
        for k in range(1, 6):
            z = z + params_ref[3 * k + j] * rows[k]
        z = z + params_ref[18 + j]                    # + b1[j]
        h.append(jax.nn.sigmoid(z))

    # Layer 2: single output logit.
    logit = params_ref[24] + params_ref[21] * h[0]
    logit = logit + params_ref[22] * h[1]
    logit = logit + params_ref[23] * h[2]

    probs_ref[...] = jax.nn.sigmoid(logit).astype(jnp.bfloat16)
    # Fused Model.test() threshold: sigmoid(z) > 0.5  <=>  z > 0.
    preds_ref[...] = (logit > 0.0).astype(jnp.int8)


@functools.partial(jax.jit, static_argnames=("block_rows",))
def mlp_forward(x, w1, b1, w2, b2, *, block_rows=1024):
    """Pallas forward. x: (B, 6) f32 -> (probs (B, 1) f32, preds (B,) int32).

    block_rows is the number of 128-sample rows per grid step (1024 rows =
    131072 samples, ~7 MiB double-buffered VMEM; must be a multiple of 32 so
    the int8 output tile constraint holds when the grid has >1 step).
    """
    B = x.shape[0]
    rows = pl.cdiv(B, _LANES)                 # 128-sample rows needed
    if rows <= block_rows:
        s = rows                              # single step; block == full dims
        rows_pad = rows
    else:
        s = block_rows                        # multiple of 32 (int8 tiling)
        rows_pad = pl.cdiv(rows, s) * s
    b_pad = rows_pad * _LANES

    # Feature-major layout with tail-only padding (fused by XLA under jit),
    # then a free row-major reshape to (6, rows_pad, 128).
    x_t = jnp.pad(x.astype(jnp.float32).T, ((0, 0), (0, b_pad - B)))
    x_t = x_t.reshape(6, rows_pad, _LANES)

    # Pack the 25 parameter scalars into a single SMEM-resident array.
    params = jnp.concatenate(
        [w1.reshape(-1), b1.reshape(-1), w2.reshape(-1), b2.reshape(-1)]
    ).astype(jnp.float32)                     # (25,)

    probs_t, preds_t = pl.pallas_call(
        mlp_kernel,
        out_shape=(
            jax.ShapeDtypeStruct((rows_pad, _LANES), jnp.bfloat16),
            jax.ShapeDtypeStruct((rows_pad, _LANES), jnp.int8),
        ),
        grid_spec=pltpu.PrefetchScalarGridSpec(
            num_scalar_prefetch=0,
            grid=(rows_pad // s,),
            in_specs=[
                pl.BlockSpec(memory_space=pltpu.MemorySpace.SMEM),   # params
                pl.BlockSpec((6, s, _LANES), lambda i: (0, i, 0)),   # x tile
            ],
            out_specs=(
                pl.BlockSpec((s, _LANES), lambda i: (i, 0)),
                pl.BlockSpec((s, _LANES), lambda i: (i, 0)),
            ),
        ),
        compiler_params=pltpu.CompilerParams(
            dimension_semantics=("parallel",),
        ),
    )(params, x_t)

    # Public dtypes kept as f32 probs / int32 preds (cheap, tiny post-ops).
    probs = probs_t.reshape(-1)[:B].astype(jnp.float32).reshape(B, 1)
    preds = preds_t.reshape(-1)[:B].astype(jnp.int32)
    return probs, preds


def model_test(x, w1, b1, w2, b2):
    """Equivalent of Model.test(): probabilities plus >0.5 predictions (0/1)."""
    return mlp_forward(x, w1, b1, w2, b2)


def init_params(key):
    # Deterministic init mirroring nn.Linear's U(-1/sqrt(fan_in), 1/sqrt(fan_in)).
    k1, k2, k3, k4 = jax.random.split(key, 4)
    bound1 = 1.0 / jnp.sqrt(6.0)
    bound2 = 1.0 / jnp.sqrt(3.0)
    w1 = jax.random.uniform(k1, (6, 3), jnp.float32, -bound1, bound1)
    b1 = jax.random.uniform(k2, (3,), jnp.float32, -bound1, bound1)
    w2 = jax.random.uniform(k3, (3, 1), jnp.float32, -bound2, bound2)
    b2 = jax.random.uniform(k4, (1,), jnp.float32, -bound2, bound2)
    return w1, b1, w2, b2


if __name__ == "__main__":
    key = jax.random.PRNGKey(0)
    kx, kp = jax.random.split(key)

    # Small batch of 8 samples, 6 features each
    # (Pclass, SibSp, Parch, Fare, Sex_female, Sex_male after get_dummies).
    # TODO(synk): pandas CSV loading / get_dummies preprocessing is out of
    # scope for the kernel; synthetic features stand in for the Titanic data.
    B = 8
    x = jax.random.uniform(kx, (B, 6), jnp.float32, 0.0, 3.0)

    w1, b1, w2, b2 = init_params(kp)

    probs, preds = model_test(x, w1, b1, w2, b2)
    jax.block_until_ready(probs)
    jax.block_until_ready(preds)

    # Pure-JAX reference check of the forward semantics.
    h_ref = jax.nn.sigmoid(x @ w1 + b1)
    y_ref = jax.nn.sigmoid(h_ref @ w2 + b2)
    assert probs.shape == (B, 1) and preds.shape == (B,)
    # probs are round-tripped through bf16 in HBM -> ~1e-2 tolerance.
    assert jnp.allclose(probs, y_ref, atol=1e-2), "probs mismatch vs reference"
    assert jnp.array_equal(preds, (y_ref[:, 0] > 0.5).astype(jnp.int32)), \
        "preds mismatch vs reference"

    print("KERNEL_OK")
</pallas_src>

<mosaic_0001>
module attributes {stable_mosaic.version = 11 : i64} {
  func.func @mlp_kernel(%arg0: i32, %arg1: memref<25xf32, #tpu.memory_space<smem>>, %arg2: memref<6x1x128xf32, #tpu.memory_space<vmem>>, %arg3: memref<1x128xbf16, #tpu.memory_space<vmem>>, %arg4: memref<1x128xi8, #tpu.memory_space<vmem>>) attributes {dimension_semantics = [#tpu.dimension_semantics<parallel>], iteration_bounds = array<i64: 1>, scalar_prefetch = 0 : i64, scratch_operands = 0 : i64, tpu.core_type = #tpu.core_type<tc>, window_params = [{transform_indices = @transform_0, window_bounds = array<i64: 25>}, {transform_indices = @transform_1, window_bounds = array<i64: 6, 1, 128>}, {transform_indices = @transform_2, window_bounds = array<i64: 1, 128>}, {transform_indices = @transform_3, window_bounds = array<i64: 1, 128>}]} {
    %c0 = arith.constant 0 : index
    %c0_0 = arith.constant 0 : index
    %c0_1 = arith.constant 0 : index
    %0 = vector.load %arg2[%c0, %c0_0, %c0_1] : memref<6x1x128xf32, #tpu.memory_space<vmem>>, vector<1x1x128xf32>
    %1 = vector.shape_cast %0 : vector<1x1x128xf32> to vector<1x128xf32>
    %c1 = arith.constant 1 : index
    %c0_2 = arith.constant 0 : index
    %c0_3 = arith.constant 0 : index
    %2 = vector.load %arg2[%c1, %c0_2, %c0_3] : memref<6x1x128xf32, #tpu.memory_space<vmem>>, vector<1x1x128xf32>
    %3 = vector.shape_cast %2 : vector<1x1x128xf32> to vector<1x128xf32>
    %c2 = arith.constant 2 : index
    %c0_4 = arith.constant 0 : index
    %c0_5 = arith.constant 0 : index
    %4 = vector.load %arg2[%c2, %c0_4, %c0_5] : memref<6x1x128xf32, #tpu.memory_space<vmem>>, vector<1x1x128xf32>
    %5 = vector.shape_cast %4 : vector<1x1x128xf32> to vector<1x128xf32>
    %c3 = arith.constant 3 : index
    %c0_6 = arith.constant 0 : index
    %c0_7 = arith.constant 0 : index
    %6 = vector.load %arg2[%c3, %c0_6, %c0_7] : memref<6x1x128xf32, #tpu.memory_space<vmem>>, vector<1x1x128xf32>
    %7 = vector.shape_cast %6 : vector<1x1x128xf32> to vector<1x128xf32>
    %c4 = arith.constant 4 : index
    %c0_8 = arith.constant 0 : index
    %c0_9 = arith.constant 0 : index
    %8 = vector.load %arg2[%c4, %c0_8, %c0_9] : memref<6x1x128xf32, #tpu.memory_space<vmem>>, vector<1x1x128xf32>
    %9 = vector.shape_cast %8 : vector<1x1x128xf32> to vector<1x128xf32>
    %c5 = arith.constant 5 : index
    %c0_10 = arith.constant 0 : index
    %c0_11 = arith.constant 0 : index
    %10 = vector.load %arg2[%c5, %c0_10, %c0_11] : memref<6x1x128xf32, #tpu.memory_space<vmem>>, vector<1x1x128xf32>
    %11 = vector.shape_cast %10 : vector<1x1x128xf32> to vector<1x128xf32>
    %c0_12 = arith.constant 0 : index
    %12 = memref.load %arg1[%c0_12] : memref<25xf32, #tpu.memory_space<smem>>
    %13 = vector.broadcast %12 : f32 to vector<1x128xf32>
    %14 = arith.mulf %13, %1 : vector<1x128xf32>
    %c3_13 = arith.constant 3 : index
    %15 = memref.load %arg1[%c3_13] : memref<25xf32, #tpu.memory_space<smem>>
    %16 = vector.broadcast %15 : f32 to vector<1x128xf32>
    %17 = arith.mulf %16, %3 : vector<1x128xf32>
    %18 = arith.addf %14, %17 : vector<1x128xf32>
    %c6 = arith.constant 6 : index
    %19 = memref.load %arg1[%c6] : memref<25xf32, #tpu.memory_space<smem>>
    %20 = vector.broadcast %19 : f32 to vector<1x128xf32>
    %21 = arith.mulf %20, %5 : vector<1x128xf32>
    %22 = arith.addf %18, %21 : vector<1x128xf32>
    %c9 = arith.constant 9 : index
    %23 = memref.load %arg1[%c9] : memref<25xf32, #tpu.memory_space<smem>>
    %24 = vector.broadcast %23 : f32 to vector<1x128xf32>
    %25 = arith.mulf %24, %7 : vector<1x128xf32>
    %26 = arith.addf %22, %25 : vector<1x128xf32>
    %c12 = arith.constant 12 : index
    %27 = memref.load %arg1[%c12] : memref<25xf32, #tpu.memory_space<smem>>
    %28 = vector.broadcast %27 : f32 to vector<1x128xf32>
    %29 = arith.mulf %28, %9 : vector<1x128xf32>
    %30 = arith.addf %26, %29 : vector<1x128xf32>
    %c15 = arith.constant 15 : index
    %31 = memref.load %arg1[%c15] : memref<25xf32, #tpu.memory_space<smem>>
    %32 = vector.broadcast %31 : f32 to vector<1x128xf32>
    %33 = arith.mulf %32, %11 : vector<1x128xf32>
    %34 = arith.addf %30, %33 : vector<1x128xf32>
    %c18 = arith.constant 18 : index
    %35 = memref.load %arg1[%c18] : memref<25xf32, #tpu.memory_space<smem>>
    %36 = vector.broadcast %35 : f32 to vector<1x128xf32>
    %37 = arith.addf %34, %36 : vector<1x128xf32>
    %38 = arith.negf %37 : vector<1x128xf32>
    %39 = math.exp %38 : vector<1x128xf32>
    %cst = arith.constant 1.000000e+00 : f32
    %40 = vector.broadcast %cst : f32 to vector<1x128xf32>
    %41 = arith.addf %40, %39 : vector<1x128xf32>
    %42 = arith.divf %40, %41 : vector<1x128xf32>
    %c1_14 = arith.constant 1 : index
    %43 = memref.load %arg1[%c1_14] : memref<25xf32, #tpu.memory_space<smem>>
    %44 = vector.broadcast %43 : f32 to vector<1x128xf32>
    %45 = arith.mulf %44, %1 : vector<1x128xf32>
    %c4_15 = arith.constant 4 : index
    %46 = memref.load %arg1[%c4_15] : memref<25xf32, #tpu.memory_space<smem>>
    %47 = vector.broadcast %46 : f32 to vector<1x128xf32>
    %48 = arith.mulf %47, %3 : vector<1x128xf32>
    %49 = arith.addf %45, %48 : vector<1x128xf32>
    %c7 = arith.constant 7 : index
    %50 = memref.load %arg1[%c7] : memref<25xf32, #tpu.memory_space<smem>>
    %51 = vector.broadcast %50 : f32 to vector<1x128xf32>
    %52 = arith.mulf %51, %5 : vector<1x128xf32>
    %53 = arith.addf %49, %52 : vector<1x128xf32>
    %c10 = arith.constant 10 : index
    %54 = memref.load %arg1[%c10] : memref<25xf32, #tpu.memory_space<smem>>
    %55 = vector.broadcast %54 : f32 to vector<1x128xf32>
    %56 = arith.mulf %55, %7 : vector<1x128xf32>
    %57 = arith.addf %53, %56 : vector<1x128xf32>
    %c13 = arith.constant 13 : index
    %58 = memref.load %arg1[%c13] : memref<25xf32, #tpu.memory_space<smem>>
    %59 = vector.broadcast %58 : f32 to vector<1x128xf32>
    %60 = arith.mulf %59, %9 : vector<1x128xf32>
    %61 = arith.addf %57, %60 : vector<1x128xf32>
    %c16 = arith.constant 16 : index
    %62 = memref.load %arg1[%c16] : memref<25xf32, #tpu.memory_space<smem>>
    %63 = vector.broadcast %62 : f32 to vector<1x128xf32>
    %64 = arith.mulf %63, %11 : vector<1x128xf32>
    %65 = arith.addf %61, %64 : vector<1x128xf32>
    %c19 = arith.constant 19 : index
    %66 = memref.load %arg1[%c19] : memref<25xf32, #tpu.memory_space<smem>>
    %67 = vector.broadcast %66 : f32 to vector<1x128xf32>
    %68 = arith.addf %65, %67 : vector<1x128xf32>
    %69 = arith.negf %68 : vector<1x128xf32>
    %70 = math.exp %69 : vector<1x128xf32>
    %cst_16 = arith.constant 1.000000e+00 : f32
    %71 = vector.broadcast %cst_16 : f32 to vector<1x128xf32>
    %72 = arith.addf %71, %70 : vector<1x128xf32>
    %73 = arith.divf %71, %72 : vector<1x128xf32>
    %c2_17 = arith.constant 2 : index
    %74 = memref.load %arg1[%c2_17] : memref<25xf32, #tpu.memory_space<smem>>
    %75 = vector.broadcast %74 : f32 to vector<1x128xf32>
    %76 = arith.mulf %75, %1 : vector<1x128xf32>
    %c5_18 = arith.constant 5 : index
    %77 = memref.load %arg1[%c5_18] : memref<25xf32, #tpu.memory_space<smem>>
    %78 = vector.broadcast %77 : f32 to vector<1x128xf32>
    %79 = arith.mulf %78, %3 : vector<1x128xf32>
    %80 = arith.addf %76, %79 : vector<1x128xf32>
    %c8 = arith.constant 8 : index
    %81 = memref.load %arg1[%c8] : memref<25xf32, #tpu.memory_space<smem>>
    %82 = vector.broadcast %81 : f32 to vector<1x128xf32>
    %83 = arith.mulf %82, %5 : vector<1x128xf32>
    %84 = arith.addf %80, %83 : vector<1x128xf32>
    %c11 = arith.constant 11 : index
    %85 = memref.load %arg1[%c11] : memref<25xf32, #tpu.memory_space<smem>>
    %86 = vector.broadcast %85 : f32 to vector<1x128xf32>
    %87 = arith.mulf %86, %7 : vector<1x128xf32>
    %88 = arith.addf %84, %87 : vector<1x128xf32>
    %c14 = arith.constant 14 : index
    %89 = memref.load %arg1[%c14] : memref<25xf32, #tpu.memory_space<smem>>
    %90 = vector.broadcast %89 : f32 to vector<1x128xf32>
    %91 = arith.mulf %90, %9 : vector<1x128xf32>
    %92 = arith.addf %88, %91 : vector<1x128xf32>
    %c17 = arith.constant 17 : index
    %93 = memref.load %arg1[%c17] : memref<25xf32, #tpu.memory_space<smem>>
    %94 = vector.broadcast %93 : f32 to vector<1x128xf32>
    %95 = arith.mulf %94, %11 : vector<1x128xf32>
    %96 = arith.addf %92, %95 : vector<1x128xf32>
    %c20 = arith.constant 20 : index
    %97 = memref.load %arg1[%c20] : memref<25xf32, #tpu.memory_space<smem>>
    %98 = vector.broadcast %97 : f32 to vector<1x128xf32>
    %99 = arith.addf %96, %98 : vector<1x128xf32>
    %100 = arith.negf %99 : vector<1x128xf32>
    %101 = math.exp %100 : vector<1x128xf32>
    %cst_19 = arith.constant 1.000000e+00 : f32
    %102 = vector.broadcast %cst_19 : f32 to vector<1x128xf32>
    %103 = arith.addf %102, %101 : vector<1x128xf32>
    %104 = arith.divf %102, %103 : vector<1x128xf32>
    %c24 = arith.constant 24 : index
    %105 = memref.load %arg1[%c24] : memref<25xf32, #tpu.memory_space<smem>>
    %c21 = arith.constant 21 : index
    %106 = memref.load %arg1[%c21] : memref<25xf32, #tpu.memory_space<smem>>
    %107 = vector.broadcast %106 : f32 to vector<1x128xf32>
    %108 = arith.mulf %107, %42 : vector<1x128xf32>
    %109 = vector.broadcast %105 : f32 to vector<1x128xf32>
    %110 = arith.addf %109, %108 : vector<1x128xf32>
    %c22 = arith.constant 22 : index
    %111 = memref.load %arg1[%c22] : memref<25xf32, #tpu.memory_space<smem>>
    %112 = vector.broadcast %111 : f32 to vector<1x128xf32>
    %113 = arith.mulf %112, %73 : vector<1x128xf32>
    %114 = arith.addf %110, %113 : vector<1x128xf32>
    %c23 = arith.constant 23 : index
    %115 = memref.load %arg1[%c23] : memref<25xf32, #tpu.memory_space<smem>>
    %116 = vector.broadcast %115 : f32 to vector<1x128xf32>
    %117 = arith.mulf %116, %104 : vector<1x128xf32>
    %118 = arith.addf %114, %117 : vector<1x128xf32>
    %119 = arith.negf %118 : vector<1x128xf32>
    %120 = math.exp %119 : vector<1x128xf32>
    %cst_20 = arith.constant 1.000000e+00 : f32
    %121 = vector.broadcast %cst_20 : f32 to vector<1x128xf32>
    %122 = arith.addf %121, %120 : vector<1x128xf32>
    %123 = arith.divf %121, %122 : vector<1x128xf32>
    %124 = arith.truncf %123 : vector<1x128xf32> to vector<1x128xbf16>
    %c0_21 = arith.constant 0 : index
    %c0_22 = arith.constant 0 : index
    %125 = vector.load %arg3[%c0_21, %c0_22] : memref<1x128xbf16, #tpu.memory_space<vmem>>, vector<1x128xbf16>
    tpu.vector_store %arg3[%c0_21, %c0_22], %124 {strides = array<i32>} : memref<1x128xbf16, #tpu.memory_space<vmem>>, vector<1x128xbf16>,
    %cst_23 = arith.constant 0.000000e+00 : f32
    %126 = vector.broadcast %cst_23 : f32 to vector<1x128xf32>
    %127 = arith.cmpf ogt, %118, %126 : vector<1x128xf32>
    %128 = arith.extui %127 : vector<1x128xi1> to vector<1x128xi8>
    %c0_24 = arith.constant 0 : index
    %c0_25 = arith.constant 0 : index
    %129 = vector.load %arg4[%c0_24, %c0_25] : memref<1x128xi8, #tpu.memory_space<vmem>>, vector<1x128xi8>
    tpu.vector_store %arg4[%c0_24, %c0_25], %128 {strides = array<i32>} : memref<1x128xi8, #tpu.memory_space<vmem>>, vector<1x128xi8>,
    return
  }
  func.func @transform_0(%arg0: i32) -> i32 {
    %c0_i32 = arith.constant 0 : i32
    %c0_i32_0 = arith.constant 0 : i32
    return %c0_i32 : i32
  }
  func.func @transform_1(%arg0: i32) -> (i32, i32, i32) {
    %c0_i32 = arith.constant 0 : i32
    %c0_i32_0 = arith.constant 0 : i32
    %c0_i32_1 = arith.constant 0 : i32
    return %c0_i32, %arg0, %c0_i32_0 : i32, i32, i32
  }
  func.func @transform_2(%arg0: i32) -> (i32, i32) {
    %c0_i32 = arith.constant 0 : i32
    %c0_i32_0 = arith.constant 0 : i32
    return %arg0, %c0_i32 : i32, i32
  }
  func.func @transform_3(%arg0: i32) -> (i32, i32) {
    %c0_i32 = arith.constant 0 : i32
    %c0_i32_0 = arith.constant 0 : i32
    return %arg0, %c0_i32 : i32, i32
  }
}

</mosaic_0001>

<bundles_post_ra>
// kernel: mlp_forward.1
= control target key start
LH: loop header
LB: loop body
LE: loop exit
PB: predicated region body
PF: predicated region fallthrough
CT: control target
= control target key end

     0   :  { %9 = vsyncpa [#allocation3], 0  ;;  %s353_s0 = inlined_call_operand.vmem [shape: f32[25], index: 0, kind: input, shape index: {}]   ;;  %s354_s1 = inlined_call_operand.vmem [shape: f32[6,1,128], index: 1, kind: input, shape index: {}]   ;;  %s355_s2 = inlined_call_operand.vmem [shape: bf16[1,128], index: 2, kind: output, shape index: {0}]   ;;  %s356_s3 = inlined_call_operand.vmem [shape: s8[1,128], index: 3, kind: output, shape index: {1}]  }
   0x1   :  { %s16_s14 = sshll.u32 %s353_s0, 4  ;;  %s17_s14 = int_to_ptr.vmem [resolvable:$true] %s16_s14 }
   0x2   :  { %s234_s15 = scalar_lea.vmem %s17_s14, 16  ;;  %p239_p1 = scmp.lt.s32.totalorder %s17_s14, %s17_s14 }
   0x3   :  { %p235_p0 = scmp.ne.s32.totalorder %s17_s14, %s234_s15  ;;  %p240_p2 = scmp.lt.s32.totalorder %s234_s15, %s234_s15 }
   0x5   :  { %p241_p3 = por %p240_p2, %p239_p1 }
   0x7   :  { %p242_p4 = pnand %p241_p3, %p235_p0 }
   0x9   :  { %245 = shalt.err (!%p242_p4)
}
   0xa   :  { %s248_s16 = smov [#allocation2]  }
   0xb   :  { %19 = dma.vmem_to_smem %s17_s14, 16, %s248_s16, [#allocation3]  }
   0xc   :  { %246 = dma.done.wait [#allocation3], 16  }
   0xd   :  { %247 = vsyncadd [#allocation3], 4294967280 }
   0xe   :  { %25 = sfence }
   0xf   :  { %s39_s17 = sld [smem:[#allocation2]]  ;;  %s188_s18 = sld [smem:[#allocation2 + $0x3]]  ;;  %v28_v0 = vld [vmem:[%s354_s1] sm:$0x1]  ;;  %v183_v1 = vld [vmem:[%s354_s1 + $0x1] sm:$0x1] }
  0x10   :  { %s189_s19 = sld [smem:[#allocation2 + $0x6]]  ;;  %s190_s20 = sld [smem:[#allocation2 + $0x9]]  ;;  %v184_v2 = vld [vmem:[%s354_s1 + $0x2] sm:$0x1]  ;;  %v185_v3 = vld [vmem:[%s354_s1 + $0x3] sm:$0x1] }
  0x11   :  { %s273_s21 = sld [smem:[#allocation2 + $0xc]]  ;;  %s275_s0 = sld [smem:[#allocation2 + $0xf]]  ;;  %v186_v6 = vld [vmem:[%s354_s1 + $0x4] sm:$0x1]  ;;  %v187_v13 = vld [vmem:[%s354_s1 + $0x5] sm:$0x1] }
  0x12   :  { %s280_s24 = sld [smem:[#allocation2 + $0x12]]  ;;  %s282_s25 = sld [smem:[#allocation2 + $0x1]]  ;;  %vm156_vm1 = vcmask 1040384   ;;  %vm169_vm2 = vsmask.f32 0 }
  0x13   :  { %s287_s28 = sld [smem:[#allocation2 + $0x4]]  ;;  %s289_s29 = sld [smem:[#allocation2 + $0x7]]  ;;  %vm170_vm3 = vmand %vm156_vm1, %vm169_vm2  ;;  %vm157_vm5 = vsmask.f32 256 }
  0x14   :  { %s294_s5 = sld [smem:[#allocation2 + $0xa]]  ;;  %s296_s6 = sld [smem:[#allocation2 + $0xd]]  ;;  %vm158_vm6 = vmand %vm156_vm1, %vm157_vm5 }
  0x15   :  { %v40_v4 = vstv %s39_s17  ;;  %v43_v5 = vstv %s188_s18  ;;  %s301_s9 = sld [smem:[#allocation2 + $0x10]]  ;;  %s306_s12 = sld [smem:[#allocation2 + $0x2]] }
  0x16   :  { %v41_v7 = vmul.f32 %v40_v4, %v28_v0  ;;  %v44_v8 = vmul.f32 %v183_v1, %v43_v5  ;;  %v47_v9 = vstv %s189_s19  ;;  %v51_v10 = vstv %s190_s20  ;;  %s308_s13 = sld [smem:[#allocation2 + $0x5]]  ;;  %s311_s14 = sld [smem:[#allocation2 + $0x8]] }
  0x17   :  { %v48_v11 = vmul.f32 %v184_v2, %v47_v9  ;;  %v55_v12 = vstv %s273_s21  ;;  %s313_s15 = sld [smem:[#allocation2 + $0xb]]  ;;  %v52_v15 = vmul.f32 %v185_v3, %v51_v10  ;;  %v59_v16 = vstv %s275_s0  ;;  %s319_s18 = sld [smem:[#allocation2 + $0xe]] }
  0x18   :  { %v45_v14 = vadd.f32 %v44_v8, %v41_v7  ;;  %v56_v17 = vmul.f32 %v186_v6, %v55_v12  ;;  %v72_v18 = vstv %s282_s25  ;;  %s324_s19 = sld [smem:[#allocation2 + $0x11]]  ;;  %v60_v25 = vmul.f32 %v187_v13, %v59_v16  ;;  %s329_s1 = sld [smem:[#allocation2 + $0x13]] }
  0x19   :  { %v75_v19 = vstv %s287_s28  ;;  %v79_v20 = vstv %s289_s29  ;;  %v73_v22 = vmul.f32 %v72_v18, %v28_v0  ;;  %v63_v26 = vstv %s280_s24  ;;  %s209_s20 = sld [smem:[#allocation2 + $0x14]]  ;;  %s212_s21 = sld [smem:[#allocation2 + $0x15]] }
  0x1a   :  { %v49_v21 = vadd.f32 %v48_v11, %v45_v14  ;;  %v76_v23 = vmul.f32 %v183_v1, %v75_v19  ;;  %v80_v24 = vmul.f32 %v184_v2, %v79_v20  ;;  %v83_v27 = vstv %s294_s5  ;;  %s211_s0 = sld [smem:[#allocation2 + $0x18]]  ;;  %s213_s22 = sld [smem:[#allocation2 + $0x16]] }
  0x1b   :  { %v87_v28 = vstv %s296_s6  ;;  %v84_v31 = vmul.f32 %v185_v3, %v83_v27  ;;  %v91_v32 = vstv %s301_s9  ;;  %v104_v34 = vstv %s306_s12  ;;  %s214_s23 = sld [smem:[#allocation2 + $0x17]] }
  0x1c   :  { %v53_v29 = vadd.f32 %v52_v15, %v49_v21  ;;  %v77_v30 = vadd.f32 %v76_v23, %v73_v22  ;;  %v88_v33 = vmul.f32 %v186_v6, %v87_v28  ;;  %v107_v35 = vstv %s308_s13 }
  0x1d   :  { %v111_v36 = vstv %s311_s14  ;;  %v105_v39 = vmul.f32 %v104_v34, %v28_v0  ;;  %v108_v40 = vmul.f32 %v183_v1, %v107_v35  ;;  %v92_v41 = vmul.f32 %v187_v13, %v91_v32  ;;  %v159_v32 = vld [vmem:[%s355_s2] sm:$0x1] }
  0x1e   :  { %v57_v37 = vadd.f32 %v56_v17, %v53_v29  ;;  %v81_v38 = vadd.f32 %v80_v24, %v77_v30  ;;  %v112_v42 = vmul.f32 %v184_v2, %v111_v36  ;;  %v115_v43 = vstv %s313_s15 }
  0x1f   :  { %v119_v44 = vstv %s319_s18  ;;  %v109_v47 = vadd.f32 %v108_v40, %v105_v39  ;;  %v116_v48 = vmul.f32 %v185_v3, %v115_v43  ;;  %v123_v49 = vstv %s324_s19 }
  0x20   :  { %v61_v45 = vadd.f32 %v60_v25, %v57_v37  ;;  %v85_v46 = vadd.f32 %v84_v31, %v81_v38  ;;  %v120_v53 = vmul.f32 %v186_v6, %v119_v44  ;;  %v95_v54 = vstv %s329_s1 }
  0x21   :  { %v113_v52 = vadd.f32 %v112_v42, %v109_v47  ;;  %v124_v58 = vmul.f32 %v187_v13, %v123_v49  ;;  %v127_v61 = vstv %s209_s20  ;;  %v137_v8 = vstv %s212_s21 }
  0x22   :  { %v64_v50 = vadd.f32 %v63_v26, %v61_v45  ;;  %v89_v51 = vadd.f32 %v88_v33, %v85_v46  ;;  %v139_v10 = vstv %s211_s0  ;;  %v142_v12 = vstv %s213_s22  ;;  %v171_v26 = vld [vmem:[%s356_s3] sm:$0x1] }
  0x23   :  { %v117_v57 = vadd.f32 %v116_v48, %v113_v52  ;;  %v146_v16 = vstv %s214_s23  ;;  %v249_v22 = vmov 0  }
  0x24   :  { %v194_v55 = vmul.f32 -1.442695, %v64_v50  ;;  %v93_v56 = vadd.f32 %v92_v41, %v89_v51 }
  0x25   :  { %v121_v60 = vadd.f32 %v120_v53, %v117_v57 }
  0x26   :  { %218 = vpow2.f32 %v194_v55  ;;  %v96_v59 = vadd.f32 %v95_v54, %v93_v56 }
  0x27   :  { %v125_v63 = vadd.f32 %v124_v58, %v121_v60 }
  0x28   :  { %v202_v62 = vmul.f32 -1.442695, %v96_v59 }
  0x29   :  { %v128_v0 = vadd.f32 %v127_v61, %v125_v63 }
  0x2a   :  { %220 = vpow2.f32 %v202_v62 }
  0x2b   :  { %v210_v1 = vmul.f32 -1.442695, %v128_v0 }
  0x2d   :  { %222 = vpow2.f32 %v210_v1 }
  0x30   :  { %v219_v2 = vpop.eup %218 }
  0x31   :  { %v68_v3 = vadd.f32 1.0, %v219_v2 }
  0x33   :  { %224 = vrcp.f32 %v68_v3 }
  0x34   :  { %v221_v4 = vpop.eup %220 }
  0x35   :  { %v100_v5 = vadd.f32 1.0, %v221_v4 }
  0x37   :  { %226 = vrcp.f32 %v100_v5  ;;  %v223_v6 = vpop.eup %222 }
  0x38   :  { %v132_v7 = vadd.f32 1.0, %v223_v6 }
  0x3a   :  { %228 = vrcp.f32 %v132_v7 }
  0x3d   :  { %v225_v9 = vpop.eup %224 }
  0x3e   :  { %v138_v11 = vmul.f32 %v225_v9, %v137_v8 }
  0x40   :  { %v140_v13 = vadd.f32 %v139_v10, %v138_v11 }
  0x41   :  { %v227_v14 = vpop.eup %226 }
  0x42   :  { %v143_v15 = vmul.f32 %v227_v14, %v142_v12 }
  0x44   :  { %v144_v17 = vadd.f32 %v143_v15, %v140_v13  ;;  %v229_v18 = vpop.eup %228 }
  0x45   :  { %v147_v19 = vmul.f32 %v229_v18, %v146_v16 }
  0x47   :  { %v148_v20 = vadd.f32 %v147_v19, %v144_v17 }
  0x49   :  { %v215_v21 = vmul.f32 -1.442695, %v148_v20  ;;  %vm162_vm0 = vcmp.gt.f32.partialorder %v148_v20, 0.0 }
  0x4a   :  { %v163_v23 = vsel %vm162_vm0, 1, %v249_v22 }
  0x4b   :  { %230 = vpow2.f32 %v215_v21  ;;  %v164_v24 = vpack.c.b16 %v163_v23, %v163_v23 }
  0x4d   :  { %v165_v25 = vpack.c.b8 %v164_v24, %v164_v24 }
  0x4f   :  { %vm166_vm4 = vnez %v165_v25 }
  0x50   :  { %v167_v27 = vsel %vm166_vm4, 16843009, %v249_v22 }
  0x51   :  { %v172_v28 = vsel %vm170_vm3, %v167_v27, %v171_v26 }
  0x52   :  { %173 = vst [vmem:[%s356_s3] sm:$0x1] %v172_v28 }
  0x55   :  { %v231_v29 = vpop.eup %230 }
  0x56   :  { %v152_v30 = vadd.f32 1.0, %v231_v29 }
  0x58   :  { %232 = vrcp.f32 %v152_v30 }
  0x62   :  { %v233_v31 = vpop.eup %232 }
  0x63   :  { %v155_v33 = vpack.c.bf16 %v233_v31, %v233_v31 }
  0x65   :  { %v160_v34 = vsel %vm158_vm6, %v155_v33, %v159_v32 }
  0x66   :  { %161 = vst [vmem:[%s355_s2] sm:$0x1] %v160_v34 }
  0x67   :  { %182 = vsyncpa [#allocation3], 1 }

</bundles_post_ra>
